<compile_context>
chip_gen: v7x
topology: tpu7x:2x2x1
jax: 0.10.0
libtpu: 0.0.40
codegen_flags: <defaults>
</compile_context>

<pallas_src>
import jax
import jax.numpy as jnp
from jax.experimental import pallas as pl
from jax.experimental.pallas import tpu as pltpu


_DEFAULT_BLOCK_B = 1024  # rows per grid step; multiple of 8 and 128


def predict_layer_kernel(x_ref, w1_ref, b1_ref, w2t_ref, b2t_ref, ot_ref):
    # x tile: (block_b, E).  Feed directly into the MXU (works for f32 or bf16).
    x = x_ref[...]
    h = jnp.dot(x, w1_ref[...], preferred_element_type=jnp.float32) + b1_ref[...]
    h = jnp.maximum(h, 0.0)  # ReLU; Dropout(p=0) is the identity.

    # Second layer computed in transposed form so the output tile is
    # (2, block_b): lane-dense along the batch dimension.
    #   w2t: (2, 8), h: (block_b, 8)  -- contract the hidden dim of both.
    out_t = jax.lax.dot_general(
        w2t_ref[...], h,
        dimension_numbers=(((1,), (1,)), ((), ())),
        preferred_element_type=jnp.float32,
    )
    ot_ref[...] = (out_t + b2t_ref[...]).astype(ot_ref.dtype)


def predict_layer(x, w1, b1, w2, b2, *, block_b=None):
    """Fused PredictLayer forward.

    x : (B, E)        w1 : (E, 8)   b1 : (8,) or (1, 8)
    w2 : (8, 2)       b2 : (2,) or (1, 2)
    Returns (B, 2) float32.
    """
    B, E = x.shape
    H = w1.shape[1]      # 8
    O = w2.shape[1]      # 2

    # Reshape params to the layouts the kernel expects (tiny, one-time).
    b1 = jnp.reshape(b1, (1, H))
    w2t = jnp.transpose(jnp.asarray(w2))   # (O, H)
    b2t = jnp.reshape(b2, (O, 1))

    if block_b is None:
        block_b = _DEFAULT_BLOCK_B
    if block_b >= B:
        block_b = B                        # single full-array block (always legal)
    elif block_b % 128 != 0:
        raise ValueError(
            "block_b must be a multiple of 128 (lane-dense transposed output) "
            "or >= B")

    grid = (pl.cdiv(B, block_b),)

    out_t = pl.pallas_call(
        predict_layer_kernel,
        out_shape=jax.ShapeDtypeStruct((O, B), jnp.float32),
        grid_spec=pltpu.PrefetchScalarGridSpec(
            num_scalar_prefetch=0,
            grid=grid,
            in_specs=[
                pl.BlockSpec((block_b, E), lambda i: (i, 0)),   # x tile (streamed)
                pl.BlockSpec((E, H), lambda i: (0, 0)),         # W1 (resident)
                pl.BlockSpec((1, H), lambda i: (0, 0)),         # b1
                pl.BlockSpec((O, H), lambda i: (0, 0)),         # W2^T
                pl.BlockSpec((O, 1), lambda i: (0, 0)),         # b2^T
            ],
            out_specs=pl.BlockSpec((O, block_b), lambda i: (0, i)),  # lane-dense
        ),
        compiler_params=pltpu.CompilerParams(
            dimension_semantics=("parallel",),   # megacore-shardable batch axis
        ),
    )(x, w1, b1, w2t, b2t)

    return jnp.transpose(out_t)   # (B, O): wrapper-side layout plumbing


def init_params(key, embedding_dim, hidden=8, out_dim=2):
    # Deterministic init mimicking nn.Linear default (uniform +/- 1/sqrt(fan_in)).
    k1, k2, k3, k4 = jax.random.split(key, 4)
    bound1 = 1.0 / jnp.sqrt(embedding_dim)
    bound2 = 1.0 / jnp.sqrt(hidden)
    w1 = jax.random.uniform(k1, (embedding_dim, hidden), jnp.float32, -bound1, bound1)
    b1 = jax.random.uniform(k2, (hidden,), jnp.float32, -bound1, bound1)
    w2 = jax.random.uniform(k3, (hidden, out_dim), jnp.float32, -bound2, bound2)
    b2 = jax.random.uniform(k4, (out_dim,), jnp.float32, -bound2, bound2)
    return w1, b1, w2, b2


def _reference(x, w1, b1, w2, b2):
    return jnp.maximum(x @ w1 + jnp.reshape(b1, (1, -1)), 0.0) @ w2 + jnp.reshape(b2, (1, -1))


if __name__ == "__main__":
    key = jax.random.PRNGKey(0)
    kx1, kx2, kp = jax.random.split(key, 3)

    embedding_dim = 32
    w1, b1, w2, b2 = init_params(kp, embedding_dim)

    # Small demo batch (single full-array block).
    x_small = jax.random.normal(kx1, (8, embedding_dim), dtype=jnp.float32)
    out_small = jax.block_until_ready(predict_layer(x_small, w1, b1, w2, b2))
    assert out_small.shape == (8, 2)
    assert jnp.allclose(out_small, _reference(x_small, w1, b1, w2, b2),
                        atol=1e-5, rtol=1e-5)

    # Tiled, pipelined path: multiple grid steps with a partial last tile.
    x_big = jax.random.normal(kx2, (2600, embedding_dim), dtype=jnp.float32)
    out_big = jax.block_until_ready(predict_layer(x_big, w1, b1, w2, b2))
    assert out_big.shape == (2600, 2)
    assert jnp.allclose(out_big, _reference(x_big, w1, b1, w2, b2),
                        atol=1e-5, rtol=1e-5)

    print("KERNEL_OK")
</pallas_src>

<mosaic_0001>
module attributes {stable_mosaic.version = 11 : i64} {
  func.func @predict_layer_kernel(%arg0: i32, %arg1: memref<8x32xf32, #tpu.memory_space<vmem>>, %arg2: memref<32x8xf32, #tpu.memory_space<vmem>>, %arg3: memref<1x8xf32, #tpu.memory_space<vmem>>, %arg4: memref<2x8xf32, #tpu.memory_space<vmem>>, %arg5: memref<2x1xf32, #tpu.memory_space<vmem>>, %arg6: memref<2x8xf32, #tpu.memory_space<vmem>>) attributes {dimension_semantics = [#tpu.dimension_semantics<parallel>], iteration_bounds = array<i64: 1>, scalar_prefetch = 0 : i64, scratch_operands = 0 : i64, tpu.core_type = #tpu.core_type<tc>, window_params = [{transform_indices = @transform_0, window_bounds = array<i64: 8, 32>}, {pipeline_mode = #tpu.pipeline_mode<synchronous>, transform_indices = @transform_1, window_bounds = array<i64: 32, 8>}, {pipeline_mode = #tpu.pipeline_mode<synchronous>, transform_indices = @transform_2, window_bounds = array<i64: 1, 8>}, {pipeline_mode = #tpu.pipeline_mode<synchronous>, transform_indices = @transform_3, window_bounds = array<i64: 2, 8>}, {pipeline_mode = #tpu.pipeline_mode<synchronous>, transform_indices = @transform_4, window_bounds = array<i64: 2, 1>}, {transform_indices = @transform_5, window_bounds = array<i64: 2, 8>}]} {
    %c0 = arith.constant 0 : index
    %c0_0 = arith.constant 0 : index
    %0 = vector.load %arg1[%c0, %c0_0] : memref<8x32xf32, #tpu.memory_space<vmem>>, vector<8x32xf32>
    %c0_1 = arith.constant 0 : index
    %c0_2 = arith.constant 0 : index
    %1 = vector.load %arg2[%c0_1, %c0_2] : memref<32x8xf32, #tpu.memory_space<vmem>>, vector<32x8xf32>
    %cst = arith.constant dense<0.000000e+00> : vector<8x8xf32>
    %2 = tpu.matmul %0, %1, %cst {dimension_numbers = #tpu.dot_dimension_numbers<[1], [0], [0], [1], [0, 0, 1, 1], [], []>} : vector<8x32xf32>, vector<32x8xf32>, vector<8x8xf32> -> vector<8x8xf32>
    %c0_3 = arith.constant 0 : index
    %c0_4 = arith.constant 0 : index
    %3 = vector.load %arg3[%c0_3, %c0_4] : memref<1x8xf32, #tpu.memory_space<vmem>>, vector<1x8xf32>
    %4 = vector.broadcast %3 : vector<1x8xf32> to vector<8x8xf32>
    %5 = arith.addf %2, %4 : vector<8x8xf32>
    %cst_5 = arith.constant 0.000000e+00 : f32
    %6 = vector.broadcast %cst_5 : f32 to vector<8x8xf32>
    %7 = arith.maximumf %5, %6 : vector<8x8xf32>
    %c0_6 = arith.constant 0 : index
    %c0_7 = arith.constant 0 : index
    %8 = vector.load %arg4[%c0_6, %c0_7] : memref<2x8xf32, #tpu.memory_space<vmem>>, vector<2x8xf32>
    %cst_8 = arith.constant dense<0.000000e+00> : vector<2x8xf32>
    %9 = tpu.matmul %8, %7, %cst_8 {dimension_numbers = #tpu.dot_dimension_numbers<[1], [1], [0], [0], [0, 0, 1, 0], [], []>} : vector<2x8xf32>, vector<8x8xf32>, vector<2x8xf32> -> vector<2x8xf32>
    %c0_9 = arith.constant 0 : index
    %c0_10 = arith.constant 0 : index
    %10 = vector.load %arg5[%c0_9, %c0_10] : memref<2x1xf32, #tpu.memory_space<vmem>>, vector<2x1xf32>
    %11 = vector.broadcast %10 : vector<2x1xf32> to vector<2x8xf32>
    %12 = arith.addf %9, %11 : vector<2x8xf32>
    %c0_11 = arith.constant 0 : index
    %c0_12 = arith.constant 0 : index
    %13 = vector.load %arg6[%c0_11, %c0_12] : memref<2x8xf32, #tpu.memory_space<vmem>>, vector<2x8xf32>
    tpu.vector_store %arg6[%c0_11, %c0_12], %12 {strides = array<i32>} : memref<2x8xf32, #tpu.memory_space<vmem>>, vector<2x8xf32>,
    return
  }
  func.func @transform_0(%arg0: i32) -> (i32, i32) {
    %c0_i32 = arith.constant 0 : i32
    %c0_i32_0 = arith.constant 0 : i32
    return %arg0, %c0_i32 : i32, i32
  }
  func.func @transform_1(%arg0: i32) -> (i32, i32) {
    %c0_i32 = arith.constant 0 : i32
    %c0_i32_0 = arith.constant 0 : i32
    %c0_i32_1 = arith.constant 0 : i32
    return %c0_i32, %c0_i32_0 : i32, i32
  }
  func.func @transform_2(%arg0: i32) -> (i32, i32) {
    %c0_i32 = arith.constant 0 : i32
    %c0_i32_0 = arith.constant 0 : i32
    %c0_i32_1 = arith.constant 0 : i32
    return %c0_i32, %c0_i32_0 : i32, i32
  }
  func.func @transform_3(%arg0: i32) -> (i32, i32) {
    %c0_i32 = arith.constant 0 : i32
    %c0_i32_0 = arith.constant 0 : i32
    %c0_i32_1 = arith.constant 0 : i32
    return %c0_i32, %c0_i32_0 : i32, i32
  }
  func.func @transform_4(%arg0: i32) -> (i32, i32) {
    %c0_i32 = arith.constant 0 : i32
    %c0_i32_0 = arith.constant 0 : i32
    %c0_i32_1 = arith.constant 0 : i32
    return %c0_i32, %c0_i32_0 : i32, i32
  }
  func.func @transform_5(%arg0: i32) -> (i32, i32) {
    %c0_i32 = arith.constant 0 : i32
    %c0_i32_0 = arith.constant 0 : i32
    return %c0_i32, %arg0 : i32, i32
  }
}

</mosaic_0001>

<bundles_post_ra>
// kernel: tpu_custom_call.1
= control target key start
LH: loop header
LB: loop body
LE: loop exit
PB: predicated region body
PF: predicated region fallthrough
CT: control target
= control target key end

     0   :  { %v271_v3 = vmov 0.0|0.0   ;;  %vm272_vm0 = vmmov 0   ;;  %v273_v6 = vmov 0.0   ;;  %s342_s0 = inlined_call_operand.vmem [shape: f32[8,32], index: 0, kind: input, shape index: {}]   ;;  %s343_s1 = inlined_call_operand.vmem [shape: f32[32,8], index: 1, kind: input, shape index: {}]   ;;  %s344_s2 = inlined_call_operand.vmem [shape: f32[1,8], index: 2, kind: input, shape index: {}]   ;;  %s345_s3 = inlined_call_operand.vmem [shape: f32[2,8], index: 3, kind: input, shape index: {}]   ;;  %s346_s4 = inlined_call_operand.vmem [shape: f32[2,1], index: 4, kind: input, shape index: {}]   ;;  %s347_s5 = inlined_call_operand.hbm [shape: f32[2,8], index: 5, kind: output, shape index: {}]  }
   0x1   :  { %v22_v0 = vld [vmem:[%s343_s1] sm:$0xff]  ;;  %v23_v1 = vld [vmem:[%s343_s1 + $0x8] sm:$0xff]  ;;  %v24_v2 = vld [vmem:[%s343_s1 + $0x10] sm:$0xff]  ;;  %235 = vmatprep.subr.bf16.mxu0 %v271_v3  ;;  %227 = vmatprep.mubr.msk.f32.mxu0 %vm272_vm0, %v273_v6 }
   0x2   :  { %v236_v4 = vpack.c.bf16 %v23_v1, %v22_v0  ;;  %v25_v5 = vld [vmem:[%s343_s1 + $0x18] sm:$0xff]  ;;  %230 = vmatprep.subr.mxu1 %v273_v6  ;;  %232 = vmatprep.mubr.msk.f32.mxu1 %vm272_vm0, %v273_v6 }
   0x3   :  { %10 = vsyncpa [#allocation3], 0  ;;  %v239_v7 = vpack.c.bf16 %v25_v5, %v24_v2  ;;  %v21_v8 = vld [vmem:[%s342_s0] sm:$0xff]  ;;  %vm33_vm1 = vcmask 261120   ;;  %v274_v10 = vmov 0   ;;  %vm115_vm2 = vcmask 64512  }
   0x4   :  { %237 = vmatpush3.bf16.msra.mxu0 %v236_v4  ;;  %v109_v9 = vld [vmem:[%s346_s4] sm:$0x3]  ;;  %246 = vset.pattern.permute.xlu0 %v274_v10  ;;  %s275_s4 = smov [#allocation2]   ;;  %vm192_vm3 = vcmask 58368  }
   0x5   :  { %238 = vmatprep.subr.bf16.mxu0 %v271_v3  ;;  %112 = vperm.xlu0 %246, %v109_v9   ;;  %v208_v11 = vld [vmem:[%s344_s2] ss:$0 sm:$0xff]  ;;  %s200_s7 = sshll.u32 %s275_s4, 4  ;;  %s201_s7 = int_to_ptr.vmem [resolvable:$true] %s200_s7 }
   0x6   :  { %v108_v16 = vld [vmem:[%s345_s3] sm:$0x3]  ;;  %s247_s2 = scalar_lea.vmem %s201_s7, 32  ;;  %p252_p1 = scmp.lt.s32.totalorder %s201_s7, %s201_s7 }
   0x7   :  { %p248_p0 = scmp.ne.s32.totalorder %s201_s7, %s247_s2  ;;  %p253_p2 = scmp.lt.s32.totalorder %s247_s2, %s247_s2 }
   0x8   :  { %240 = vmatpush3.bf16.msra.mxu0 %v239_v7 }
   0x9   :  { %p254_p3 = por %p253_p2, %p252_p1 }
   0xb   :  { %228 = vmatmul.mubr.msk.f32.vlgmr.msra.gmra.mrb[0].mxu0 %vm33_vm1, %v21_v8  ;;  %p255_p4 = pnand %p254_p3, %p248_p0 }
  0x84   :  { %v113_v17 = vpop.permute.xlu0 %112 }
  0xde   :  { %v103_v12 = vpop.f32.mrb[0].mxu0 }
  0xdf   :  { %v104_v13 = vadd.f32 %v208_v11, %v103_v12  ;;  %v229_v14 = vpop.f32.mrb[1].mxu0 }
  0xe1   :  { %v107_v15 = vmax.f32 %v104_v13, 0.0 }
  0xe3   :  { %231 = vmatpush3.xpose.msk.msra.mxu1 %vm115_vm2, %v107_v15 }
  0xe6   :  { %233 = vmatmul.mubr.msk.f32.vlgmr.msra.gmra.mrb[0].mxu1 %vm115_vm2, %v108_v16 }
 0x1b9   :  { %v188_v18 = vpop.f32.mrb[0].mxu1 }
 0x1ba   :  { %v189_v19 = vadd.f32 %v188_v18, %v113_v17  ;;  %v234_v20 = vpop.f32.mrb[1].mxu1 }
 0x1bc   :  { %193 = vst.msk [vmem:[#allocation2] sm:$0x3] %vm192_vm3, %v189_v19 }
 0x1bd   :  { %258 = shalt.err (!%p255_p4)
}
 0x1be   :  { %s259_s3 = scalar_lea.hbm %s347_s5, 32 }
 0x1bf   :  { %p260_p5 = scmp.ne.s32.totalorder %s347_s5, %s259_s3  ;;  %p263_p6 = scmp.lt.u32.totalorder %s259_s3, %s347_s5 }
 0x1c1   :  { %p265_p7 = pnand %p263_p6, %p260_p5 }
 0x1c3   :  { %268 = shalt.err (!%p265_p7)
}
 0x1c4   :  { %203 = dma.vmem_to_hbm [thread:$0]  %s201_s7, 32, %s347_s5, [#allocation3]  }
 0x1c5   :  { %269 = dma.done.wait [#allocation3], 32  }
 0x1c6   :  { %270 = vsyncadd [#allocation3], 4294967264 }
 0x1c7   :  { %207 = vsyncpa [#allocation3], 1 }

</bundles_post_ra>
